<compile_context>
chip_gen: v6e
topology: v6e:2x2x1
jax: 0.10.0
libtpu: 0.0.40
codegen_flags: <defaults>
</compile_context>

<pallas_src>
import numpy as np
import jax
import jax.numpy as jnp
from jax.experimental import pallas as pl
from jax.experimental.pallas import tpu as pltpu


_MAX_LANES = 1024          # lane-dense last dim (multiple of 128)
_BLOCK_BYTES = 2 << 20     # ~2 MiB per block per stream (v5e-safe double-buffered)


def _round_up(a: int, b: int) -> int:
    return (a + b - 1) // b * b


def _sublane_pack(dtype) -> int:
    # sublane packing: 8 rows for 4-byte, 16 for 2-byte, 32 for 1-byte dtypes
    return max(8, 32 // jnp.dtype(dtype).itemsize)


def _choose_lanes(total: int):
    """Largest multiple of 128 (<= _MAX_LANES) that divides `total`, else None."""
    for lanes in range(_MAX_LANES, 0, -128):
        if total % lanes == 0:
            return lanes
    return None


def _layout_flat(total: int):
    """(rows, lanes, padded) for a lane-dense 2-D view of `total` elements."""
    lanes = _choose_lanes(total)
    if lanes is not None:
        return total // lanes, lanes, False
    # Element count not a multiple of 128: pad the flat tail up to 128 lanes.
    # This is the only case that copies.
    # TODO(synk): split the sub-128 tail into a tiny separate op to avoid the
    # full-tensor pad/slice round trip on unaligned shapes.
    lanes = 128
    return _round_up(total, lanes) // lanes, lanes, True


def _pick_row_tile(m: int, lanes: int, itemsize: int, pack: int,
                   other_blocks: int = 1) -> int:
    """Row tile: as big as the ~2 MiB block budget allows, but split so the
    grid has >= 2 steps (v7x megacore) when the slab spans > `pack` rows."""
    tm_cap = max(pack, (_BLOCK_BYTES // (lanes * itemsize)) // pack * pack)
    if m <= tm_cap:
        tm = m                        # single full-extent block (always legal)
        if m > pack and other_blocks < 2:
            tm = _round_up(pl.cdiv(m, 2), pack)   # guarantee >= 2 grid steps
    else:
        tm = tm_cap                   # multiple of `pack`; final block ragged
    return tm


def _to_slab(a, total, m, lanes, padded, fill):
    flat = a.reshape(-1)
    if padded:
        flat = jnp.pad(flat, (0, m * lanes - total), constant_values=fill)
    return flat.reshape(m, lanes)


def _from_slab(out2, total, orig_shape, padded):
    flat = out2.reshape(-1)
    if padded:
        flat = flat[:total]
    return flat.reshape(orig_shape)


def _row_broadcast_plan(x_shape, y, dtype, itemsize, pack):
    """If `y` (broadcastable to x_shape) is constant over a trailing suffix of
    x_shape whose size is lane-worthy (>= 128 elements), return
    (rows, trail, tl, y_rows) where y_rows is the tiny (rows, 1) per-row
    divisor; otherwise None."""
    nd = len(x_shape)
    y_shape = tuple(jnp.shape(y))
    yb = (1,) * (nd - len(y_shape)) + y_shape
    t = nd
    while t > 0 and yb[t - 1] == 1:
        t -= 1
    if t == 0 or t == nd:
        return None                      # scalar-like, or y varies on last dim
    trail = int(np.prod(x_shape[t:]))
    rows = int(np.prod(x_shape[:t]))
    if trail < 128:
        return None                      # lane-sparse output; not worth it
    tl = _choose_lanes(trail)
    if tl is None:
        # trailing extent not a multiple of 128: take it whole as the lane
        # block (legal: block dim == full array dim) if a minimal tile fits.
        if trail * pack * itemsize > _BLOCK_BYTES:
            return None
        tl = trail
    y_rows = jnp.broadcast_to(jnp.asarray(y, dtype=dtype).reshape(yb[:t]),
                              x_shape[:t]).reshape(rows, 1)
    return rows, trail, tl, y_rows


def _div_kernel(x_ref, y_ref, o_ref):
    # Elementwise (or row-broadcast: y_ref is (tm, 1)) divide on a VMEM tile.
    o_ref[...] = (x_ref[...] / y_ref[...]).astype(o_ref.dtype)


def _div_scalar_kernel(x_ref, y_ref, o_ref):
    # y_ref: (1,) float32 divisor in SMEM.  True division in f32 (not
    # x * (1/y)) keeps torch.div semantics even for bf16 x / extreme y; the
    # kernel stays HBM-bound so the EUP divide costs nothing.
    o_ref[...] = (x_ref[...].astype(jnp.float32) / y_ref[0]).astype(o_ref.dtype)


def eltwise_div(x, y, inplace=False):
    """Pallas implementation of EltwiseDiv.forward(x, y)."""
    x = jnp.asarray(x)
    y_is_scalar = (jnp.ndim(y) == 0) or int(np.prod(jnp.shape(y))) == 1

    if not y_is_scalar:
        # torch broadcasting: if y's shape dominates, the output takes it (rare).
        bshape = tuple(np.broadcast_shapes(tuple(x.shape), tuple(jnp.shape(y))))
        if bshape != tuple(x.shape):
            x = jnp.broadcast_to(x, bshape)

    orig_shape = x.shape
    dtype = x.dtype
    itemsize = jnp.dtype(dtype).itemsize
    pack = _sublane_pack(dtype)
    total = int(np.prod(orig_shape)) if len(orig_shape) else 1
    if total == 0:
        return x

    parallel1 = pltpu.CompilerParams(dimension_semantics=("parallel",))

    # ---------------- scalar divisor: one x stream + SMEM scalar ------------
    if y_is_scalar:
        m, lanes, padded = _layout_flat(total)
        x2 = _to_slab(x, total, m, lanes, padded, fill=0)
        tm = _pick_row_tile(m, lanes, itemsize, pack)
        block = pl.BlockSpec((tm, lanes), lambda i: (i, 0))
        y_arr = jnp.asarray(y, dtype=jnp.float32).reshape(1)
        out2 = pl.pallas_call(
            _div_scalar_kernel,
            out_shape=jax.ShapeDtypeStruct((m, lanes), dtype),
            grid=(pl.cdiv(m, tm),),
            in_specs=[block, pl.BlockSpec(memory_space=pltpu.SMEM)],
            out_specs=block,
            compiler_params=parallel1,
            input_output_aliases={0: 0} if (inplace and not padded) else {},
        )(x2, y_arr)
        return _from_slab(out2, total, orig_shape, padded)

    y = jnp.asarray(y, dtype=dtype)

    # ------- trailing-broadcast divisor (e.g. per-channel (1,C,1,1)) --------
    if y.shape != orig_shape:
        plan = _row_broadcast_plan(orig_shape, y, dtype, itemsize, pack)
        if plan is not None:
            rows, trail, tl, y_rows = plan
            x2 = x.reshape(rows, trail)                 # bitcast, no copy
            lane_blocks = pl.cdiv(trail, tl)
            tm = _pick_row_tile(rows, tl, itemsize, pack, other_blocks=lane_blocks)
            x_spec = pl.BlockSpec((tm, tl), lambda i, j: (i, j))
            y_spec = pl.BlockSpec((tm, 1), lambda i, j: (i, 0))
            out2 = pl.pallas_call(
                _div_kernel,
                out_shape=jax.ShapeDtypeStruct((rows, trail), dtype),
                grid=(pl.cdiv(rows, tm), lane_blocks),
                in_specs=[x_spec, y_spec],
                out_specs=x_spec,
                compiler_params=pltpu.CompilerParams(
                    dimension_semantics=("parallel", "parallel")),
                input_output_aliases={0: 0} if inplace else {},
            )(x2, y_rows)
            return out2.reshape(orig_shape)
        # TODO(synk): non-trailing broadcast patterns (e.g. (N,1,H,W)) still
        # materialize the divisor; they would need a transposed slab layout.
        y = jnp.broadcast_to(y, orig_shape)

    # ------------------ same-shape divisor: two x-sized streams -------------
    m, lanes, padded = _layout_flat(total)
    x2 = _to_slab(x, total, m, lanes, padded, fill=0)
    y2 = _to_slab(y, total, m, lanes, padded, fill=1)   # 1s keep padded lanes finite
    tm = _pick_row_tile(m, lanes, itemsize, pack)
    block = pl.BlockSpec((tm, lanes), lambda i: (i, 0))
    out2 = pl.pallas_call(
        _div_kernel,
        out_shape=jax.ShapeDtypeStruct((m, lanes), dtype),
        grid=(pl.cdiv(m, tm),),
        in_specs=[block, block],
        out_specs=block,
        compiler_params=parallel1,
        input_output_aliases={0: 0} if (inplace and not padded) else {},
    )(x2, y2)
    return _from_slab(out2, total, orig_shape, padded)


if __name__ == "__main__":
    key = jax.random.PRNGKey(0)
    kx, ky = jax.random.split(key)

    # NCHW activation, as EltwiseDiv sees it in distiller-quantized conv nets.
    x = jax.random.normal(kx, (2, 4, 16, 16), dtype=jnp.float32)
    y_full = jax.random.uniform(ky, (2, 4, 16, 16), dtype=jnp.float32,
                                minval=0.5, maxval=2.0)
    y_chan = jnp.linspace(0.5, 2.0, 4, dtype=jnp.float32).reshape(1, 4, 1, 1)
    y_scalar = 2.5

    # tensor / same-shape tensor (two-stream flat path, zero-copy slab)
    out_t = jax.block_until_ready(eltwise_div(x, y_full))
    np.testing.assert_allclose(np.asarray(out_t), np.asarray(x / y_full),
                               rtol=1e-6, atol=1e-6)

    # tensor / per-channel tensor (in-kernel row broadcast, y not materialized)
    out_c = jax.block_until_ready(eltwise_div(x, y_chan))
    np.testing.assert_allclose(np.asarray(out_c), np.asarray(x / y_chan),
                               rtol=1e-6, atol=1e-6)

    # tensor / scalar (SMEM f32 scalar, true division)
    out_s = jax.block_until_ready(eltwise_div(x, y_scalar))
    np.testing.assert_allclose(np.asarray(out_s), np.asarray(x / y_scalar),
                               rtol=1e-6, atol=1e-6)

    # inplace=True (output aliases the x slab; same math)
    out_i = jax.block_until_ready(eltwise_div(x, y_full, inplace=True))
    np.testing.assert_allclose(np.asarray(out_i), np.asarray(x / y_full),
                               rtol=1e-6, atol=1e-6)

    # unaligned element count -> padded fallback path still correct
    x_odd = jax.random.normal(kx, (3, 5, 7), dtype=jnp.float32)
    y_odd = jax.random.uniform(ky, (3, 5, 7), dtype=jnp.float32,
                               minval=0.5, maxval=2.0)
    out_o = jax.block_until_ready(eltwise_div(x_odd, y_odd))
    np.testing.assert_allclose(np.asarray(out_o), np.asarray(x_odd / y_odd),
                               rtol=1e-6, atol=1e-6)

    print("KERNEL_OK")
</pallas_src>

<mosaic_0001>
module attributes {stable_mosaic.version = 11 : i64} {
  func.func @_div_kernel(%arg0: i32, %arg1: memref<2x1024xf32, #tpu.memory_space<vmem>>, %arg2: memref<2x1024xf32, #tpu.memory_space<vmem>>, %arg3: memref<2x1024xf32, #tpu.memory_space<vmem>>) attributes {dimension_semantics = [#tpu.dimension_semantics<parallel>], iteration_bounds = array<i64: 1>, scalar_prefetch = 0 : i64, scratch_operands = 0 : i64, tpu.core_type = #tpu.core_type<tc>, window_params = [{transform_indices = @transform_0, window_bounds = array<i64: 2, 1024>}, {transform_indices = @transform_1, window_bounds = array<i64: 2, 1024>}, {transform_indices = @transform_2, window_bounds = array<i64: 2, 1024>}]} {
    %c0 = arith.constant 0 : index
    %c0_0 = arith.constant 0 : index
    %0 = vector.load %arg1[%c0, %c0_0] : memref<2x1024xf32, #tpu.memory_space<vmem>>, vector<2x1024xf32>
    %c0_1 = arith.constant 0 : index
    %c0_2 = arith.constant 0 : index
    %1 = vector.load %arg2[%c0_1, %c0_2] : memref<2x1024xf32, #tpu.memory_space<vmem>>, vector<2x1024xf32>
    %2 = arith.divf %0, %1 : vector<2x1024xf32>
    %c0_3 = arith.constant 0 : index
    %c0_4 = arith.constant 0 : index
    %3 = vector.load %arg3[%c0_3, %c0_4] : memref<2x1024xf32, #tpu.memory_space<vmem>>, vector<2x1024xf32>
    tpu.vector_store %arg3[%c0_3, %c0_4], %2 {strides = array<i32>} : memref<2x1024xf32, #tpu.memory_space<vmem>>, vector<2x1024xf32>,
    return
  }
  func.func @transform_0(%arg0: i32) -> (i32, i32) {
    %c0_i32 = arith.constant 0 : i32
    %c0_i32_0 = arith.constant 0 : i32
    return %arg0, %c0_i32 : i32, i32
  }
  func.func @transform_1(%arg0: i32) -> (i32, i32) {
    %c0_i32 = arith.constant 0 : i32
    %c0_i32_0 = arith.constant 0 : i32
    return %arg0, %c0_i32 : i32, i32
  }
  func.func @transform_2(%arg0: i32) -> (i32, i32) {
    %c0_i32 = arith.constant 0 : i32
    %c0_i32_0 = arith.constant 0 : i32
    return %arg0, %c0_i32 : i32, i32
  }
}

</mosaic_0001>

<bundles_post_ra>
// kernel: tpu_custom_call.1
= control target key start
LH: loop header
LB: loop body
LE: loop exit
PB: predicated region body
PF: predicated region fallthrough
CT: control target
= control target key end

     0   :  { %7 = vsyncpa [#allocation3], 0  ;;  %s162_s0 = inlined_call_operand.hbm [shape: f32[2,1024], index: 0, kind: input, shape index: {}]   ;;  %s163_s1 = inlined_call_operand.hbm [shape: f32[2,1024], index: 1, kind: input, shape index: {}]   ;;  %s164_s2 = inlined_call_operand.hbm [shape: f32[2,1024], index: 2, kind: output, shape index: {}]  }
   0x1   :  { %8 = vsyncpa [#allocation6], 0 }
   0x2   :  { %9 = vsyncpa [#allocation4], 0  ;;  %s135_s9 = smov [#allocation2]   ;;  %s136_s11 = smov [#allocation5]  }
   0x3   :  { %s16_s10 = sshll.u32 %s135_s9, 4  ;;  %s26_s12 = sshll.u32 %s136_s11, 4  ;;  %s17_s10 = int_to_ptr.vmem [resolvable:$true] %s16_s10  ;;  %s27_s12 = int_to_ptr.vmem [resolvable:$true] %s26_s12 }
   0x4   :  { %s77_s13 = scalar_lea.vmem %s17_s10, 256  ;;  %p82_p1 = scmp.lt.s32.totalorder %s17_s10, %s17_s10 }
   0x5   :  { %p78_p0 = scmp.ne.s32.totalorder %s17_s10, %s77_s13  ;;  %p83_p2 = scmp.lt.s32.totalorder %s77_s13, %s77_s13 }
   0x7   :  { %p84_p3 = por %p83_p2, %p82_p1 }
   0x9   :  { %p85_p4 = pnand %p84_p3, %p78_p0 }
   0xb   :  { %88 = shalt.err (!%p85_p4)
}
   0xc   :  { %19 = dma.hbm_to_vmem [thread:$0]  %s162_s0, 256, %s17_s10, [#allocation3]  }
   0xd   :  { %s97_s16 = scalar_lea.vmem %s27_s12, 256  ;;  %p102_p6 = scmp.lt.s32.totalorder %s27_s12, %s27_s12 }
   0xe   :  { %p98_p5 = scmp.ne.s32.totalorder %s27_s12, %s97_s16  ;;  %p103_p7 = scmp.lt.s32.totalorder %s97_s16, %s97_s16 }
  0x10   :  { %p104_p8 = por %p103_p7, %p102_p6 }
  0x12   :  { %p105_p9 = pnand %p104_p8, %p98_p5 }
  0x14   :  { %108 = shalt.err (!%p105_p9)
}
  0x15   :  { %29 = dma.hbm_to_vmem [thread:$0]  %s163_s1, 256, %s27_s12, [#allocation6]  }
  0x16   :  { %129 = dma.done.wait [#allocation3], 256  }
  0x17   :  { %130 = vsyncadd [#allocation3], 4294967040 }
  0x18   :  { %131 = dma.done.wait [#allocation6], 256  }
  0x19   :  { %132 = vsyncadd [#allocation6], 4294967040  ;;  %v38_v0 = vld [vmem:[#allocation5] sm:$0xff]  ;;  %v39_v1 = vld [vmem:[#allocation5 + $0x8] sm:$0xff]  ;;  %s137_s0 = smov [#allocation7]  }
  0x1a   :  { %65 = vrcp.f32 %v38_v0  ;;  %v36_v2 = vld [vmem:[#allocation2] sm:$0xff]  ;;  %v37_v3 = vld [vmem:[#allocation2 + $0x8] sm:$0xff]  ;;  %s52_s19 = sshll.u32 %s137_s0, 4  ;;  %s53_s19 = int_to_ptr.vmem [resolvable:$true] %s52_s19 }
  0x1b   :  { %67 = vrcp.f32 %v39_v1  ;;  %s109_s1 = scalar_lea.vmem %s53_s19, 256  ;;  %p114_p11 = scmp.lt.s32.totalorder %s53_s19, %s53_s19 }
  0x1c   :  { %p110_p10 = scmp.ne.s32.totalorder %s53_s19, %s109_s1  ;;  %p115_p12 = scmp.lt.s32.totalorder %s109_s1, %s109_s1 }
  0x1e   :  { %p116_p13 = por %p115_p12, %p114_p11 }
  0x20   :  { %p117_p0 = pnand %p116_p13, %p110_p10 }
  0x27   :  { %v66_v4 = vpop.eup %65 }
  0x28   :  { %v68_v5 = vpop.eup %67  ;;  %v41_v6 = vmul.f32 %v66_v4, %v36_v2 }
  0x29   :  { %v43_v7 = vmul.f32 %v68_v5, %v37_v3 }
  0x2a   :  { %44 = vst [vmem:[#allocation7] sm:$0xff] %v41_v6 }
  0x2b   :  { %45 = vst [vmem:[#allocation7 + $0x8] sm:$0xff] %v43_v7 }
  0x2c   :  { %120 = shalt.err (!%p117_p0)
}
  0x2d   :  { %55 = dma.vmem_to_hbm [thread:$0]  %s53_s19, 256, %s164_s2, [#allocation4]  }
  0x2e   :  { %133 = dma.done.wait [#allocation4], 256  }
  0x2f   :  { %134 = vsyncadd [#allocation4], 4294967040 }
  0x30   :  { %59 = vsyncpa [#allocation3], 1 }
  0x31   :  { %60 = vsyncpa [#allocation6], 1 }
  0x32   :  { %61 = vsyncpa [#allocation4], 1 }

</bundles_post_ra>
